<compile_context>
chip_gen: v5e
topology: v5e:2x2
jax: 0.10.0
libtpu: 0.0.40
codegen_flags: <defaults>
</compile_context>

<pallas_src>
import functools
import math

import jax
import jax.numpy as jnp
from jax.experimental import pallas as pl
from jax.experimental.pallas import tpu as pltpu

LANES = 128
SUBLANES = 8
NCORES = 2                 # leading parallel grid axis (v7x has 2 TCs; no-op elsewhere)
DEFAULT_ROW_TILE = 2048    # (2048, 128) f32 block = 1 MiB; x2 double-buffered = 2 MiB
MIN_PALLAS_ELEMS = SUBLANES * LANES  # below this a pallas_call costs more than it saves


def _round_up(x: int, m: int) -> int:
    return ((x + m - 1) // m) * m


def _sum_log2_kernel(x_ref, acc_ref, *, rows, tr, nb, need_mask):
    """Accumulate a per-core partial sum of log2(x) into an (8, 128) output block."""
    c = pl.program_id(0)   # parallel (core) axis
    i = pl.program_id(1)   # arbitrary (streaming / reduction) axis

    @pl.when(i == 0)
    def _():
        acc_ref[...] = jnp.zeros_like(acc_ref)

    x = x_ref[...].astype(jnp.float32)
    if need_mask:
        row0 = (c * nb + i) * tr
        row_ids = row0 + jax.lax.broadcasted_iota(jnp.int32, (tr, LANES), 0)
        # Mask BEFORE the log so masked lanes never feed garbage to the EUP.
        x = jnp.where(row_ids < rows, x, 1.0)
    logx = jnp.log2(x)
    # VPU-only partial reduction: collapse the row tile onto one (8, 128) vreg.
    acc_ref[...] += jnp.sum(logx.reshape(tr // SUBLANES, SUBLANES, LANES), axis=0)


def sum_log2(x: jax.Array, *, row_tile: int = DEFAULT_ROW_TILE) -> jax.Array:
    """sum(log2(x)) over all elements of x, streamed through a Pallas kernel."""
    n = x.size
    if n == 0:
        return jnp.float32(0.0)

    flat = x.reshape(-1)                      # metadata-only for contiguous input
    if n < MIN_PALLAS_ELEMS:
        return jnp.sum(jnp.log2(flat.astype(jnp.float32)))

    rows = n // LANES
    rem = n - rows * LANES
    if rem:
        # Rare non-multiple-of-128 tail handled in plain JAX (no full-tensor pad).
        tail_sum = jnp.sum(jnp.log2(flat[rows * LANES:].astype(jnp.float32)))
        main = flat[: rows * LANES].reshape(rows, LANES)
    else:
        tail_sum = jnp.float32(0.0)
        main = flat.reshape(rows, LANES)

    tr = min(row_tile, _round_up(rows, SUBLANES))
    tr = _round_up(tr, SUBLANES)
    num_blocks = pl.cdiv(rows, tr)
    nb = pl.cdiv(num_blocks, NCORES)            # blocks per core
    need_mask = (NCORES * nb * tr != rows)      # any padded / over-range block?

    def in_index(c, i):
        # Clamp over-range block indices (their contribution is fully masked).
        return (jnp.minimum(c * nb + i, num_blocks - 1), 0)

    kernel = functools.partial(
        _sum_log2_kernel, rows=rows, tr=tr, nb=nb, need_mask=need_mask
    )

    partials = pl.pallas_call(
        kernel,
        out_shape=jax.ShapeDtypeStruct((NCORES, SUBLANES, LANES), jnp.float32),
        grid_spec=pltpu.PrefetchScalarGridSpec(
            num_scalar_prefetch=0,
            grid=(NCORES, nb),
            in_specs=[pl.BlockSpec((tr, LANES), in_index)],
            out_specs=pl.BlockSpec((None, SUBLANES, LANES), lambda c, i: (c, 0, 0)),
        ),
        compiler_params=pltpu.CompilerParams(
            dimension_semantics=("parallel", "arbitrary"),
        ),
    )(main)

    # Single tiny cross-lane reduce outside the hot loop.
    return jnp.sum(partials) + tail_sum


def rate_distortion_loss(output: dict, target: jax.Array) -> dict:
    """JAX/Pallas equivalent of RateDistortionLoss.forward (bpp_loss)."""
    n, _, h, w = target.shape
    num_pixels = n * h * w
    scale = -float(num_pixels)   # log2 in-kernel folds away the ln(2) factor

    bpp = jnp.float32(0.0)
    for likelihoods in output["likelihoods"].values():
        bpp = bpp + sum_log2(likelihoods) / scale
    return {"bpp_loss": bpp}


if __name__ == "__main__":
    key = jax.random.PRNGKey(0)
    k1, k2, k3, k4, k5, k6 = jax.random.split(key, 6)

    # Small shapes consistent with a compression model's outputs:
    # target image NCHW = (2, 3, 16, 16); latents y (2, 4, 16, 16), z (2, 4, 4, 4).
    target = jax.random.normal(k1, (2, 3, 16, 16), dtype=jnp.float32)
    # Likelihoods must be in (0, 1]; use uniform in (eps, 1).
    y_lik = jax.random.uniform(k2, (2, 4, 16, 16), dtype=jnp.float32,
                               minval=1e-3, maxval=1.0)   # 2048 elems -> Pallas path
    z_lik = jax.random.uniform(k3, (2, 4, 4, 4), dtype=jnp.float32,
                               minval=1e-3, maxval=1.0)   # 128 elems  -> tiny jnp path
    x_hat = jax.random.normal(k4, (2, 3, 16, 16), dtype=jnp.float32)

    output = {"x_hat": x_hat, "likelihoods": {"y": y_lik, "z": z_lik}}

    result = rate_distortion_loss(output, target)
    bpp = jax.block_until_ready(result["bpp_loss"])

    # Pure-JAX reference check of the full loss.
    n, _, h, w = target.shape
    num_pixels = n * h * w
    ref = sum(
        jnp.sum(jnp.log(v.astype(jnp.float32))) / (-math.log(2.0) * num_pixels)
        for v in output["likelihoods"].values()
    )
    assert jnp.allclose(bpp, ref, rtol=1e-5, atol=1e-5), (bpp, ref)

    # Extra checks: multi-block streaming + in-kernel masking of a partial last
    # block (rows=345 with row_tile=64), and the non-multiple-of-128 tail path.
    a = jax.random.uniform(k5, (3, 5, 23, 128), dtype=jnp.float32,
                           minval=1e-3, maxval=1.0)
    got_a = jax.block_until_ready(sum_log2(a, row_tile=64))
    want_a = jnp.sum(jnp.log2(a))
    assert jnp.allclose(got_a, want_a, rtol=1e-5, atol=1e-3), (got_a, want_a)

    b = jax.random.uniform(k6, (9, 11, 13), dtype=jnp.float32,
                           minval=1e-3, maxval=1.0)       # 1287 elems: 7-elem tail
    got_b = jax.block_until_ready(sum_log2(b))
    want_b = jnp.sum(jnp.log2(b))
    assert jnp.allclose(got_b, want_b, rtol=1e-5, atol=1e-3), (got_b, want_b)

    print("KERNEL_OK")
</pallas_src>

<mosaic_0001>
module attributes {stable_mosaic.version = 11 : i64} {
  func.func @_sum_log2_kernel(%arg0: i32, %arg1: i32, %arg2: memref<16x128xf32, #tpu.memory_space<vmem>>, %arg3: memref<1x8x128xf32, #tpu.memory_space<vmem>>) attributes {dimension_semantics = [#tpu.dimension_semantics<parallel>, #tpu.dimension_semantics<arbitrary>], iteration_bounds = array<i64: 2, 1>, scalar_prefetch = 0 : i64, scratch_operands = 0 : i64, tpu.core_type = #tpu.core_type<tc>, window_params = [{transform_indices = @transform_0, window_bounds = array<i64: 16, 128>}, {transform_indices = @transform_1, window_bounds = array<i64: 1, 8, 128>}]} {
    %c0_i32 = arith.constant 0 : i32
    %0 = arith.cmpi eq, %arg1, %c0_i32 : i32
    %1 = arith.extui %0 : i1 to i32
    %c0_i32_0 = arith.constant 0 : i32
    %2 = arith.cmpi ne, %1, %c0_i32_0 : i32
    scf.if %2 {
      %cst_11 = arith.constant 0.000000e+00 : f32
      %26 = vector.broadcast %cst_11 : f32 to vector<8x128xf32>
      %c0_12 = arith.constant 0 : index
      %c0_13 = arith.constant 0 : index
      %c0_14 = arith.constant 0 : index
      %27 = vector.load %arg3[%c0_12, %c0_13, %c0_14] : memref<1x8x128xf32, #tpu.memory_space<vmem>>, vector<1x8x128xf32>
      %28 = vector.shape_cast %27 : vector<1x8x128xf32> to vector<8x128xf32>
      %29 = vector.shape_cast %26 : vector<8x128xf32> to vector<1x8x128xf32>
      tpu.vector_store %arg3[%c0_12, %c0_13, %c0_14], %29 {strides = array<i32>} : memref<1x8x128xf32, #tpu.memory_space<vmem>>, vector<1x8x128xf32>,
    } else {
    }
    %c0 = arith.constant 0 : index
    %c0_1 = arith.constant 0 : index
    %3 = vector.load %arg2[%c0, %c0_1] : memref<16x128xf32, #tpu.memory_space<vmem>>, vector<16x128xf32>
    %c1_i32 = arith.constant 1 : i32
    %4 = arith.muli %arg0, %c1_i32 : i32
    %5 = arith.addi %4, %arg1 : i32
    %c16_i32 = arith.constant 16 : i32
    %6 = arith.muli %5, %c16_i32 : i32
    %7 = tpu.iota {dimensions = array<i32: 0>} : vector<16x128xi32>
    %8 = vector.broadcast %6 : i32 to vector<16x128xi32>
    %9 = arith.addi %8, %7 : vector<16x128xi32>
    %c16_i32_2 = arith.constant 16 : i32
    %10 = vector.broadcast %c16_i32_2 : i32 to vector<16x128xi32>
    %11 = arith.cmpi slt, %9, %10 : vector<16x128xi32>
    %cst = arith.constant 1.000000e+00 : f32
    %12 = vector.broadcast %cst : f32 to vector<16x128xf32>
    %13 = arith.select %11, %3, %12 : vector<16x128xi1>, vector<16x128xf32>
    %14 = math.log %13 : vector<16x128xf32>
    %cst_3 = arith.constant 2.000000e+00 : f32
    %15 = math.log %cst_3 : f32
    %16 = vector.broadcast %15 : f32 to vector<16x128xf32>
    %17 = arith.divf %14, %16 : vector<16x128xf32>
    %c0_4 = arith.constant 0 : index
    %c0_5 = arith.constant 0 : index
    %c0_6 = arith.constant 0 : index
    %18 = vector.load %arg3[%c0_4, %c0_5, %c0_6] : memref<1x8x128xf32, #tpu.memory_space<vmem>>, vector<1x8x128xf32>
    %19 = vector.shape_cast %18 : vector<1x8x128xf32> to vector<8x128xf32>
    %20 = vector.shape_cast %17 : vector<16x128xf32> to vector<2x8x128xf32>
    %cst_7 = arith.constant dense<0.000000e+00> : vector<8x128xf32>
    %21 = vector.multi_reduction <add>, %20, %cst_7 [0] : vector<2x8x128xf32> to vector<8x128xf32>
    %22 = arith.addf %19, %21 : vector<8x128xf32>
    %c0_8 = arith.constant 0 : index
    %c0_9 = arith.constant 0 : index
    %c0_10 = arith.constant 0 : index
    %23 = vector.load %arg3[%c0_8, %c0_9, %c0_10] : memref<1x8x128xf32, #tpu.memory_space<vmem>>, vector<1x8x128xf32>
    %24 = vector.shape_cast %23 : vector<1x8x128xf32> to vector<8x128xf32>
    %25 = vector.shape_cast %22 : vector<8x128xf32> to vector<1x8x128xf32>
    tpu.vector_store %arg3[%c0_8, %c0_9, %c0_10], %25 {strides = array<i32>} : memref<1x8x128xf32, #tpu.memory_space<vmem>>, vector<1x8x128xf32>,
    return
  }
  func.func @transform_0(%arg0: i32, %arg1: i32) -> (i32, i32) {
    %c1_i32 = arith.constant 1 : i32
    %0 = arith.muli %arg0, %c1_i32 : i32
    %1 = arith.addi %0, %arg1 : i32
    %c0_i32 = arith.constant 0 : i32
    %2 = arith.minsi %1, %c0_i32 : i32
    %c0_i32_0 = arith.constant 0 : i32
    %c0_i32_1 = arith.constant 0 : i32
    return %2, %c0_i32_0 : i32, i32
  }
  func.func @transform_1(%arg0: i32, %arg1: i32) -> (i32, i32, i32) {
    %c0_i32 = arith.constant 0 : i32
    %c0_i32_0 = arith.constant 0 : i32
    %c0_i32_1 = arith.constant 0 : i32
    return %arg0, %c0_i32, %c0_i32_0 : i32, i32, i32
  }
}

</mosaic_0001>

<bundles_post_ra>
// kernel: tpu_custom_call.1
= control target key start
LH: loop header
LB: loop body
LE: loop exit
PB: predicated region body
PF: predicated region fallthrough
CT: control target
= control target key end

     0   :  { %6 = vsyncpa [#allocation3], 0  ;;  %s698_s0 = inlined_call_operand.hbm [shape: f32[16,128], index: 0, kind: input, shape index: {}]   ;;  %s699_s1 = inlined_call_operand.hbm [shape: f32[2,8,128], index: 1, kind: output, shape index: {}]  }
   0x1   :  { %8 = vsyncpa [#allocation3 + $0x1], 0 }
   0x2   :  { %9 = vsyncpa [#allocation4], 0 }
   0x3   :  { %11 = vsyncpa [#allocation4 + $0x1], 0  ;;  %s553_s6 = smov 0   ;;  %s555_s7 = smov 0  }
   0x4   :  { %s557_s8 = smov 0   ;;  %s559_s9 = smov 0  }
   0x5   :  { %s561_s10 = smov 0   ;;  %s563_s11 = smov 0  }
   0x6   :  { %s565_s12 = smov 0   ;;  %s567_s13 = smov 0  }
   0x7 LB: > { %s292_s14 = sadd.s32 4294967295, %s537_s13   ;;  %s293_s15 = sadd.s32 4294967294, %s537_s13   ;;  %s537_s13 = sphi %s567_s13, %s17_s13   ;;  %s533_s12 = sphi %s565_s12, %s710_s12   ;;  %s529_s11 = sphi %s563_s11, %s709_s11   ;;  %s525_s10 = sphi %s561_s10, %s688_s10   ;;  %s521_s9 = sphi %s559_s9, %s708_s9   ;;  %s517_s8 = sphi %s557_s8, %s707_s8   ;;  %s513_s7 = sphi %s555_s7, %s706_s7   ;;  %s509_s6 = sphi %s553_s6, %s705_s6  }
   0x8   : > { %s29_s16 = sadd.s32 1, %s533_s12  ;;  %p506_p1 = scmp.ne.s32.totalorder %s525_s10, 0 }
   0x9   : > { %p31_p0 = scmp.ge.s32.totalorder %s29_s16, 2  ;;  %p50_p2 = scmp.eq.s32.totalorder %s537_s13, 0 }
   0xa   : > { %p55_p3 = scmp.ne.s32.totalorder %s525_s10, %s521_s9  ;;  %p56_p5 = scmp.eq.s32.totalorder %s292_s14, 0 }
   0xb   : > { %s712_s16 = smov (%p31_p0, %s29_s16), 0  ;;  %p599_p4 = por %p506_p1, %p50_p2 }
   0xc   : > { %p603_p6 = por %p56_p5, %p55_p3  ;;  %s65_s19 = ssub.s32 %s533_s12, %s712_s16 }
   0xd   : > { %p66_p7 = scmp.eq.s32.totalorder %s65_s19, 0  ;;  %s68_s20 = sadd.s32 1, %s517_s8 }
   0xe   : > { %p78_p8 = scmp.ne.s32.totalorder %s517_s8, %s513_s7  ;;  %p79_p9 = scmp.eq.s32.totalorder %s292_s14, 1 }
   0xf   : > { %s611_s21 = scalar_select %p66_p7, %s517_s8, %s68_s20  }
  0x10   : > { %p84_p10 = scmp.ne.s32.totalorder %s513_s7, %s509_s6  ;;  %p85_p11 = scmp.eq.s32.totalorder %s293_s15, 1 }
  0x11   : > { %p617_p12 = por %p79_p9, %p78_p8  ;;  %p295_p13 = scmp.ge.s32.totalorder %s537_s13, 2 }
  0x12   : > { %p622_p0 = por %p85_p11, %p84_p10  ;;  %p320_p1 = scmp.lt.s32.totalorder %s537_s13, 2 }
  0x13   : > { %s118_s26 = sshll.u32 %s698_s0, 4  ;;  %s539_s27 = smov [#allocation2]   ;;  %s119_s26 = int_to_ptr.hbm [resolvable:$true] %s118_s26 }
  0x14   : > { %s120_s28 = sshll.u32 %s539_s27, 4  ;;  %p632_p2 = pnand %p320_p1, %p599_p4  ;;  %s121_s28 = int_to_ptr.vmem [resolvable:$true] %s120_s28 }
  0x15   : > { %p299_p3 = scmp.ge.s32.totalorder %s537_s13, 1  ;;  %p128_p5 = scmp.lt.s32.totalorder %s537_s13, 3 }
  0x16   : > { %s404_s30 = sshra.s32 %s119_s26, 4  ;;  %p408_p8 = pneg %p632_p2  ;;  %s405_s30 = int_to_ptr.hbm [resolvable:$true] %s404_s30 }
  0x17   : > { %s406_s2 = scalar_lea.hbm %s405_s30, 16  ;;  %s411_s5 = scalar_lea.hbm %s698_s0, 16 }
  0x18   : > { %p407_p7 = scmp.ne.s32.totalorder %s405_s30, %s406_s2  ;;  %p413_p11 = scmp.lt.s32.totalorder %s411_s5, %s406_s2 }
  0x1a   : > { %p409_p9 = pnand %p408_p8, %p407_p7 }
  0x1c   : > { %p410_p10 = pneg %p409_p9 }
  0x1e   : > { %p415_p4 = pnand %p413_p11, %p410_p10 }
  0x20   : > { %418 = shalt.err (!%p415_p4)
}
  0x21   : > { %s540_s9 = smov 128   ;;  %s541_s14 = smov 8  }
  0x22   : > { %315 = dma.hbm_to_vmem [thread:$0]  (!%p632_p2), %s119_s26, 256, %s121_s28, [#allocation3], %s540_s9, %s540_s9, %s541_s14  }
  0x23   : > { %p129_p1 = pnand %p299_p3, %p128_p5 }
  0x24   : > { %s134_s15 = sand.u32 (!%p129_p1), 1, %s525_s10  }
  0x25   : > { %132 = sbr.rel (%p129_p1) target bundleno = 69 (0x45), region = 24  ;;  %s300_s17 = sshll.u32 (!%p129_p1), %s134_s15, 4 }
  0x26   : > { %s135_s19 = scalar_lea.sflag (!%p129_p1), [#allocation3], %s134_s15  ;;  %s138_s20 = scalar_lea.vmem (!%p129_p1), [#allocation2], %s300_s17 }
  0x2a   : > { %499 = dma.done.wait (%p603_p6), %s135_s19, 256  }
  0x2b   : > { %501 = vsyncadd (%p603_p6), %s135_s19, 4294967040  ;;  %s302_s24 = sshll.u32 %s529_s11, 4  ;;  %v171_v0 = vlaneseq  ;;  %v542_v2 = vmov 0.6931472   ;;  %v167_v8 = vld [vmem:[%s138_s20] sm:$0xff]  ;;  %v168_v9 = vld [vmem:[%s138_s20 + $0x8] sm:$0xff] }
  0x2c   : > { %v174_v1 = vstv %s302_s24  ;;  %398 = vrcp.f32 %v542_v2  ;;  %s155_s18 = sand.u32 1, %s513_s7   ;;  %s304_s26 = sshll.u32 %s529_s11, 3 }
  0x2d   : > { %v172_v3 = vshrl.u32 %v171_v0, 7  ;;  %s301_s25 = sshll.u32 %s155_s18, 3  ;;  %s209_s29 = scalar_lea.hbm %s699_s1, %s304_s26 }
  0x2e   : > { %s157_s30 = scalar_lea.vmem [#allocation5], %s301_s25  ;;  %s213_s3 = sshll.u32 %s209_s29, 4  ;;  %s214_s3 = int_to_ptr.hbm [resolvable:$true] %s213_s3 }
  0x2f   : > { %v173_v4 = vadd.s32 8, %v172_v3  ;;  %v175_v5 = vadd.s32 %v174_v1, %v172_v3  ;;  %s211_s2 = sshll.u32 %s157_s30, 4  ;;  %s199_s11 = scalar_lea.sflag [#allocation4], %s155_s18  ;;  %s212_s2 = int_to_ptr.vmem [resolvable:$true] %s211_s2 }
  0x30   : > { %s448_s4 = sshra.s32 %s214_s3, 4  ;;  %s454_s15 = scalar_lea.hbm %s699_s1, 16  ;;  %s449_s4 = int_to_ptr.hbm [resolvable:$true] %s448_s4 }
  0x31   : > { %v176_v6 = vadd.s32 %v174_v1, %v173_v4  ;;  %vm177_vm0 = vcmp.lt.s32.totalorder %v175_v5, 16  ;;  %s450_s5 = scalar_lea.hbm %s449_s4, 8  ;;  %p455_p5 = scmp.lt.s32.totalorder %s449_s4, %s699_s1 }
  0x32   : > { %v399_v7 = vpop.eup %398  ;;  %v179_v10 = vsel %vm177_vm0, %v167_v8, 1.0  ;;  %p451_p6 = scmp.ne.s32.totalorder %s449_s4, %s450_s5  ;;  %p456_p7 = scmp.lt.s32.totalorder %s454_s15, %s450_s5 }
  0x33   : > { %vm178_vm1 = vcmp.lt.s32.totalorder %v176_v6, 16  ;;  %v186_v11 = vmul.f32 0.6931472, %v399_v7  ;;  %400 = vlog2.f32 %v179_v10  ;;  %vm190_vm2 = vweird.f32 %v399_v7 }
  0x34   : > { %v180_v12 = vsel %vm178_vm1, %v168_v9, 1.0  ;;  %p452_p2 = pnand %p451_p6, %p617_p12  ;;  %p457_p8 = por %p456_p7, %p455_p5 }
  0x35   : > { %402 = vlog2.f32 %v180_v12  ;;  %v187_v13 = vsub.f32 1.0, %v186_v11 }
  0x36   : > { %p453_p3 = pneg %p452_p2 }
  0x37   : > { %v188_v14 = vmul.f32 %v399_v7, %v187_v13 }
  0x38   : > { %p458_p9 = pnand %p457_p8, %p453_p3 }
  0x39   : > { %v189_v15 = vadd.f32 %v399_v7, %v188_v14  ;;  %v401_v16 = vpop.eup %400 }
  0x3a   : > { %v182_v18 = vmul.f32 0.6931472, %v401_v16 }
  0x3b   : > { %v403_v17 = vpop.eup %402  ;;  %v191_v19 = vsel %vm190_vm2, %v399_v7, %v189_v15 }
  0x3c   : > { %v184_v20 = vmul.f32 0.6931472, %v403_v17  ;;  %v192_v21 = vmul.f32 %v191_v19, %v182_v18 }
  0x3e   : > { %v193_v22 = vmul.f32 %v191_v19, %v184_v20 }
  0x40   : > { %v195_v23 = vadd.f32 %v193_v22, %v192_v21 }
  0x42   : > { %197 = vst [vmem:[%s157_s30] sm:$0xff] %v195_v23 }
  0x43   : > { %461 = shalt.err (!%p458_p9)
}
  0x44   : > { %310 = dma.vmem_to_hbm [thread:$0]  (%p617_p12), %s212_s2, 128, %s214_s3, %s199_s11  }
  0x45 PF: > { %s225_s20 = sand.u32 1, %s509_s6   ;;  %p317_p10 = pnand %p295_p13, %p622_p0 }
  0x46   : > { %s226_s24 = scalar_lea.sflag [#allocation4], %s225_s20 }
  0x47   : > { %p318_p11 = pneg %p317_p10 }
  0x49   : > { %503 = dma.done.wait (%p318_p11), %s226_s24, 128  }
  0x4a   : > { %505 = vsyncadd (%p318_p11), %s226_s24, 4294967168  ;;  %s17_s13 = sadd.s32 1, %s537_s13   ;;  %s705_s6 = smov %s513_s7 }
  0x4b   : > { %p14_p4 = scmp.ge.s32.totalorder %s17_s13, 4   ;;  %s706_s7 = smov %s517_s8 }
  0x4c   : > { %s707_s8 = smov %s611_s21  ;;  %s708_s9 = smov %s525_s10 }
  0x4d   : > { %s688_s10 = smov 0   ;;  %s709_s11 = smov %s533_s12 }
  0x4e   : > { %s710_s12 = smov %s712_s16  ;;  %16 = sbr.rel (!%p14_p4) target bundleno = 7 (0x7), region = 73 }
  0x53   :  { %232 = vsyncpa [#allocation3], 1 }
  0x54   :  { %234 = vsyncpa [#allocation3 + $0x1], 1 }
  0x55   :  { %235 = vsyncpa [#allocation4], 1 }
  0x56   :  { %237 = vsyncpa [#allocation4 + $0x1], 1 }

</bundles_post_ra>
